<compile_context>
chip_gen: v5e
topology: v5e:2x2
jax: 0.10.0
libtpu: 0.0.40
codegen_flags: <defaults>
</compile_context>

<pallas_src>
import functools
import math

import numpy as np

import jax
import jax.numpy as jnp
from jax.experimental import pallas as pl
from jax.experimental.pallas import tpu as pltpu

_BN_EPS = 1e-5
_INV_SQRT2 = 1.0 / math.sqrt(2.0)
_LANE = 128
_SUB = 8
# MXU operand dtype (accumulation is always f32 via preferred_element_type).
_MM_DTYPE = jnp.bfloat16

_ROLL_LIKE_JNP = None  # pinned by _resolve_roll_convention() before tracing


def _resolve_roll_convention():
    """One-off probe that pins pltpu.roll's rotation direction so the
    shifted-tap convolution is correct on any jax/Mosaic build."""
    global _ROLL_LIKE_JNP
    if _ROLL_LIKE_JNP is None:
        def probe(x_ref, o_ref):
            o_ref[...] = pltpu.roll(x_ref[...], 1, 1)

        x = jnp.broadcast_to(jnp.arange(128, dtype=jnp.float32)[None, :],
                             (8, 128))
        y = pl.pallas_call(
            probe, out_shape=jax.ShapeDtypeStruct((8, 128), jnp.float32))(x)
        # jnp.roll semantics => y[0, 1] == x[0, 0] == 0.
        _ROLL_LIKE_JNP = bool(jax.device_get(y[0, 1]) == 0.0)
    return _ROLL_LIKE_JNP


# ----------------------------- in-kernel helpers -----------------------------

def _gelu(x):
    # exact (erf) GELU, matching torch.nn.GELU(approximate='none')
    return 0.5 * x * (1.0 + jax.lax.erf(x * _INV_SQRT2))


def _bn_lanes(y, gamma, beta, inv_n, valid=None):
    """Training-mode BatchNorm2d: per-channel stats over the flattened
    N*H*W lane axis (masked when the grid has padded lanes)."""
    if valid is None:
        mean = jnp.mean(y, axis=1, keepdims=True)
        d = y - mean
        var = jnp.mean(d * d, axis=1, keepdims=True)
    else:
        mean = jnp.sum(y * valid, axis=1, keepdims=True) * inv_n
        d = (y - mean) * valid
        var = jnp.sum(d * d, axis=1, keepdims=True) * inv_n
    return (y - mean) * jax.lax.rsqrt(var + _BN_EPS) * gamma + beta


def _bn_rows(y, gamma, beta):
    """Training-mode BatchNorm1d: per-feature stats over the batch rows."""
    mean = jnp.mean(y, axis=0, keepdims=True)
    var = jnp.mean(jnp.square(y - mean), axis=0, keepdims=True)
    return (y - mean) * jax.lax.rsqrt(var + _BN_EPS) * gamma + beta


def _conv3x3(x, w_ref, m_ref, *, w_img, m_pad):
    """3x3 / stride-1 / pad-1 conv of a channels-major (Cin_p, m_pad) f32
    activation.  Nine masked lane rotations (XLU) are packed into a single
    (9*Cin_p, m_pad) stack (sublane-tile aligned since Cin_p % 8 == 0) and
    contracted in ONE MXU matmul against the prebuilt (Cout_p, 9*Cin_p)
    weight; accumulation in f32."""
    if _ROLL_LIKE_JNP is None:
        raise RuntimeError("pltpu.roll convention unresolved; call "
                           "make_model() before tracing kernels")
    taps = []
    for t in range(9):
        dh, dw = t // 3 - 1, t % 3 - 1
        off = dh * w_img + dw                    # flat-lane offset of this tap
        if off == 0:
            src = x
        else:
            shift = ((-off) if _ROLL_LIKE_JNP else off) % m_pad
            src = pltpu.roll(x, shift, 1)
        taps.append(src * m_ref[t])              # zero out-of-image lanes
    stack = jnp.concatenate(taps, axis=0).astype(_MM_DTYPE)   # (9*Cin_p, M)
    return jnp.dot(w_ref[...], stack, preferred_element_type=jnp.float32)


# ---------------------------------- kernels ----------------------------------

def _conv_encoder_kernel(*refs, grids):
    """All encoder blocks fused.  grids[k] = (image_width, m_pad) per grid
    level; per-block params are (w1, w2, w3, bias_pack, downsample_sel).
    Eval-mode BNs are already folded into weights/bias."""
    nb = len(grids) - 1
    x_ref = refs[0]
    masks = refs[1:2 + nb]
    prm = refs[2 + nb:2 + nb + 5 * nb]
    outs = refs[2 + nb + 5 * nb:]

    y = x_ref[...]
    for b in range(nb):
        w_in, mp_in = grids[b]
        w_out, mp_out = grids[b + 1]
        w1, w2, w3, bp, dsel = prm[5 * b:5 * (b + 1)]
        # conv1: stride-1 conv at input resolution, then in-kernel stride-s
        # sampling via a 0/1 selection matmul (no wrapper-side im2col).
        y = _conv3x3(y, w1, masks[b], w_img=w_in, m_pad=mp_in)
        y = jnp.dot(y, dsel[...], preferred_element_type=jnp.float32)
        y = _gelu(y + bp[0])
        # conv2 / conv3 at output resolution
        y = _gelu(_conv3x3(y, w2, masks[b + 1], w_img=w_out, m_pad=mp_out)
                  + bp[1])
        y = _conv3x3(y, w3, masks[b + 1], w_img=w_out, m_pad=mp_out) + bp[2]
        outs[b][...] = y


def _conv_decoder_kernel(*refs, grids, valid, sigmoid_last):
    """All decoder blocks fused (+ final nn.Sigmoid as an extra output).
    Per-block params are (w1, w2, w3, param_pack, upsample_sel); BNs are
    training-mode with batch statistics computed in-kernel."""
    nb = len(grids) - 1
    x_ref = refs[0]
    masks = refs[1:1 + nb]
    prm = refs[1 + nb:1 + nb + 5 * nb]
    outs = refs[1 + nb + 5 * nb:]

    y = x_ref[...]
    for b in range(nb):
        w_out, mp_out = grids[b + 1]
        m_val = valid[b + 1]
        mask = masks[b]
        vl = None if m_val == mp_out else mask[4]
        inv_n = 1.0 / m_val
        w1, w2, w3, pp, usel = prm[5 * b:5 * (b + 1)]
        # convT1 stride-s: in-kernel zero-upsample (0/1 scatter matmul) then a
        # stride-1 conv of the flipped kernel (no wrapper-side dilate/im2col).
        y = jnp.dot(y, usel[...], preferred_element_type=jnp.float32)
        y = _conv3x3(y, w1, mask, w_img=w_out, m_pad=mp_out) + pp[0]
        y = _gelu(_bn_lanes(y, pp[1], pp[2], inv_n, vl))
        y = _conv3x3(y, w2, mask, w_img=w_out, m_pad=mp_out) + pp[3]
        y = _gelu(_bn_lanes(y, pp[4], pp[5], inv_n, vl))
        y = _conv3x3(y, w3, mask, w_img=w_out, m_pad=mp_out) + pp[6]
        y = _bn_lanes(y, pp[7], pp[8], inv_n, vl)
        outs[b][...] = y
    if sigmoid_last:
        outs[nb][...] = jax.nn.sigmoid(y)


def _fc_stack_kernel(*refs, plan):
    """Whole fc_encoder + fc_decoder stack.  plan[i] = (has_batchnorm, gelu)
    per Linear layer; per-layer operands are (W^T, [bias; gamma; beta])."""
    x_ref, o_ref = refs[0], refs[-1]
    prm = refs[1:-1]
    y = x_ref[...]
    for i, (has_bn, act) in enumerate(plan):
        w, p = prm[2 * i], prm[2 * i + 1]
        y = jnp.dot(y.astype(_MM_DTYPE), w[...],
                    preferred_element_type=jnp.float32) + p[0:1, :]
        if has_bn:
            y = _bn_rows(y, p[1:2, :], p[2:3, :])
        if act:
            y = _gelu(y)
    o_ref[...] = y


# ------------------------------ wrapper helpers ------------------------------

def _round_up(n, m):
    return ((n + m - 1) // m) * m


def _full_spec(shape):
    nd = len(shape)
    return pl.BlockSpec(shape, lambda i, _n=nd: (0,) * _n)


def _call(kernel, args, out_shapes):
    # TODO(synk): when N*H*W grows, tile the lane axis with a "parallel" grid
    # (v7x megacore) and set vmem_limit_bytes explicitly; at this config the
    # whole-net footprint is <1 MiB so a single grid step is optimal.
    out_shapes = tuple(out_shapes)
    return pl.pallas_call(
        kernel,
        out_shape=out_shapes,
        grid=(1,),
        in_specs=[_full_spec(a.shape) for a in args],
        out_specs=tuple(_full_spec(s.shape) for s in out_shapes),
        compiler_params=pltpu.CompilerParams(
            dimension_semantics=("arbitrary",)),
    )(*args)


def _tap_masks_np(n_img, h_img, w_img, m_pad):
    """Static {0,1} masks, one per 3x3 tap, over the zero-padded flat
    (N, H, W) lane axis.  Centre tap (index 4) == valid-lane indicator."""
    m = n_img * h_img * w_img
    idx = np.arange(m)
    hh = (idx // w_img) % h_img
    ww = idx % w_img
    rows = []
    for dh in (-1, 0, 1):
        for dw in (-1, 0, 1):
            ok = ((hh + dh >= 0) & (hh + dh < h_img) &
                  (ww + dw >= 0) & (ww + dw < w_img))
            rows.append(np.pad(ok.astype(np.float32), (0, m_pad - m)))
    return jnp.asarray(np.stack(rows).reshape(9, 1, m_pad))


def _downsample_mat(n, hi, wi, s, mi_pad, mo_pad):
    """0/1 matrix selecting the stride-s sample positions of a stride-1 conv
    output: (flat N*hi*wi padded) -> (flat N*ho*wo padded)."""
    ho, wo = (hi - 1) // s + 1, (wi - 1) // s + 1
    mat = np.zeros((mi_pad, mo_pad), np.float32)
    for b in range(n):
        for p in range(ho):
            for q in range(wo):
                mat[b * hi * wi + (s * p) * wi + (s * q),
                    b * ho * wo + p * wo + q] = 1.0
    return jnp.asarray(mat)


def _upsample_mat(n, hi, wi, s, mi_pad, mo_pad):
    """0/1 matrix scattering input lanes to the even (stride-s) positions of
    the (s*hi, s*wi) output grid (zero-dilated upsample for ConvTranspose)."""
    ho, wo = s * hi, s * wi
    mat = np.zeros((mi_pad, mo_pad), np.float32)
    for b in range(n):
        for p in range(hi):
            for q in range(wi):
                mat[b * hi * wi + p * wi + q,
                    b * ho * wo + (s * p) * wo + (s * q)] = 1.0
    return jnp.asarray(mat)


def _pad_vec(v, cp):
    return jnp.pad(v, (0, cp - v.shape[0]))


def _pack_conv_w(w, cin_p, cout_p):
    """(Cout, Cin, 3, 3) -> (Cout_p, 9*Cin_p) bf16; K index = tap*Cin_p + ci
    with tap = kh*3 + kw, matching the in-kernel tap-stack ordering."""
    cout, cin = w.shape[0], w.shape[1]
    wp = jnp.zeros((cout_p, cin_p, 3, 3), w.dtype).at[:cout, :cin].set(w)
    return jnp.transpose(wp, (0, 2, 3, 1)).reshape(cout_p, 9 * cin_p) \
              .astype(_MM_DTYPE)


def _fold_eval_bn(w, b, bn):
    """Fold an eval-mode BatchNorm2d (running stats) into conv weight/bias."""
    scale = bn["g"] * jax.lax.rsqrt(bn["rv"] + _BN_EPS)
    return w * scale[:, None, None, None], (b - bn["rm"]) * scale + bn["b"]


def _convT_as_conv(w):
    """ConvTranspose2d weight (Cin, Cout, 3, 3) -> equivalent Conv2d weight."""
    return jnp.flip(jnp.transpose(w, (1, 0, 2, 3)), axis=(2, 3))


def _pack_enc_block(blk, cin_p, cout_p):
    w1, b1 = _fold_eval_bn(blk["c1"]["w"], blk["c1"]["b"], blk["bn1"])
    w2, b2 = _fold_eval_bn(blk["c2"]["w"], blk["c2"]["b"], blk["bn2"])
    w3, b3 = _fold_eval_bn(blk["c3"]["w"], blk["c3"]["b"], blk["bn3"])
    bp = jnp.stack([_pad_vec(b1, cout_p), _pad_vec(b2, cout_p),
                    _pad_vec(b3, cout_p)])[:, :, None]       # (3, Cout_p, 1)
    return [_pack_conv_w(w1, cin_p, cout_p),
            _pack_conv_w(w2, cout_p, cout_p),
            _pack_conv_w(w3, cout_p, cout_p), bp]


def _pack_dec_block(blk, cin_p, cout_p):
    w1 = _pack_conv_w(_convT_as_conv(blk["c1"]["w"]), cin_p, cout_p)
    w2 = _pack_conv_w(_convT_as_conv(blk["c2"]["w"]), cout_p, cout_p)
    w3 = _pack_conv_w(_convT_as_conv(blk["c3"]["w"]), cout_p, cout_p)
    rows = []
    for i in (1, 2, 3):
        rows += [_pad_vec(blk[f"c{i}"]["b"], cout_p),
                 _pad_vec(blk[f"bn{i}"]["g"], cout_p),
                 _pad_vec(blk[f"bn{i}"]["b"], cout_p)]
    pp = jnp.stack(rows)[:, :, None]                         # (9, Cout_p, 1)
    return [w1, w2, w3, pp]


# --------------------------- params + full forward ---------------------------

class _KeyGen:
    def __init__(self, key):
        self._key = key

    def __call__(self):
        self._key, sub = jax.random.split(self._key)
        return sub


def _conv_init(kg, cout, cin, k=3):
    bound = 1.0 / math.sqrt(cin * k * k)
    return {"w": jax.random.uniform(kg(), (cout, cin, k, k), jnp.float32,
                                    -bound, bound),
            "b": jax.random.uniform(kg(), (cout,), jnp.float32, -bound, bound)}


def _convT_init(kg, cin, cout, k=3):
    bound = 1.0 / math.sqrt(cout * k * k)
    return {"w": jax.random.uniform(kg(), (cin, cout, k, k), jnp.float32,
                                    -bound, bound),
            "b": jax.random.uniform(kg(), (cout,), jnp.float32, -bound, bound)}


def _linear_init(kg, fin, fout):
    bound = 1.0 / math.sqrt(fin)
    return {"w": jax.random.uniform(kg(), (fout, fin), jnp.float32,
                                    -bound, bound),
            "b": jax.random.uniform(kg(), (fout,), jnp.float32, -bound, bound)}


def _bn_init(n, running_stats=False):
    bn = {"g": jnp.ones((n,), jnp.float32), "b": jnp.zeros((n,), jnp.float32)}
    if running_stats:   # eval-mode BNs (conv encoder) normalize with these
        bn["rm"] = jnp.zeros((n,), jnp.float32)
        bn["rv"] = jnp.ones((n,), jnp.float32)
    return bn


def make_model(cfg, key):
    _resolve_roll_convention()          # pin roll convention before tracing
    color = cfg["color_channels"]
    enc_sizes = list(cfg["encoder_sizes"])
    fc_sizes = list(cfg["fc_sizes"])
    strides = list(cfg["temporal_strides"])
    H, W = cfg["input_shape"]
    kg = _KeyGen(key)

    # ------------------------------ parameters ------------------------------
    enc_blocks = []
    for cin, cout in zip([color] + enc_sizes, enc_sizes):
        enc_blocks.append({
            "c1": _conv_init(kg, cout, cin), "bn1": _bn_init(cout, True),
            "c2": _conv_init(kg, cout, cout), "bn2": _bn_init(cout, True),
            "c3": _conv_init(kg, cout, cout), "bn3": _bn_init(cout, True)})

    enc_spatial = [(H, W)]
    for s in strides:
        h, w = enc_spatial[-1]
        enc_spatial.append(((h - 1) // s + 1, (w - 1) // s + 1))
    c_int = enc_sizes[-1]
    h_int, w_int = enc_spatial[-1]
    intermediate = (c_int, h_int, w_int)
    first_fc = c_int * h_int * w_int

    fc_dims = list(zip([first_fc] + fc_sizes, fc_sizes))
    fc_enc = []
    for i, (fin, fout) in enumerate(fc_dims):
        layer = {"lin": _linear_init(kg, fin, fout)}
        if i < len(fc_dims) - 1:        # last fc_encoder layer: batchnorm=False
            layer["bn"] = _bn_init(fout)
        fc_enc.append(layer)
    fc_dec = []
    for fin, fout in reversed(fc_dims):
        fc_dec.append({"lin": _linear_init(kg, fout, fin), "bn": _bn_init(fin)})

    dec_sizes = list(reversed(enc_sizes))
    dec_out_chans = dec_sizes[1:] + [color]
    dec_strides = list(reversed(strides))
    dec_blocks = []
    for cin, cout in zip(dec_sizes, dec_out_chans):
        dec_blocks.append({
            "c1": _convT_init(kg, cin, cout), "bn1": _bn_init(cout),
            "c2": _convT_init(kg, cout, cout), "bn2": _bn_init(cout),
            "c3": _convT_init(kg, cout, cout), "bn3": _bn_init(cout)})

    params = {"enc_blocks": enc_blocks, "fc_enc": fc_enc,
              "fc_dec": fc_dec, "dec_blocks": dec_blocks}

    # ---------------------------- static geometry ----------------------------
    dec_spatial = [enc_spatial[-1]]
    for s in dec_strides:
        h, w = dec_spatial[-1]
        dec_spatial.append((h * s, w * s))

    enc_cp = [_round_up(c, _SUB) for c in [color] + enc_sizes]
    dec_cp = [_round_up(c, _SUB) for c in dec_sizes[:1] + dec_out_chans]
    n_enc, n_dec = len(enc_blocks), len(dec_blocks)
    n_fc_enc = len(fc_dims)

    def forward(params, x):
        n = x.shape[0]

        def grid_info(spatial):
            # TODO(synk): deep grids pad N*H*W up to 128 lanes (75% waste at
            # this config's 2x4x4 grid); batch more images per call to fill
            # lanes when scaling.
            return [(hh, ww, n * hh * ww, _round_up(n * hh * ww, _LANE))
                    for hh, ww in spatial]

        eg, dg = grid_info(enc_spatial), grid_info(dec_spatial)

        mask_cache = {}

        def masks(g):
            hh, ww, _m, mp = g
            key_ = (hh, ww, mp)
            if key_ not in mask_cache:
                mask_cache[key_] = _tap_masks_np(n, hh, ww, mp)
            return mask_cache[key_]

        # ---------------- conv encoder: one fused kernel ----------------
        x_cm = jnp.transpose(x, (1, 0, 2, 3)).astype(jnp.float32)
        x_cm = x_cm.reshape(x.shape[1], eg[0][2])
        x_cm = jnp.pad(x_cm, ((0, enc_cp[0] - x.shape[1]),
                              (0, eg[0][3] - eg[0][2])))
        enc_args = [x_cm] + [masks(g) for g in eg]
        for b, blk in enumerate(params["enc_blocks"]):
            enc_args += _pack_enc_block(blk, enc_cp[b], enc_cp[b + 1])
            enc_args.append(_downsample_mat(n, eg[b][0], eg[b][1], strides[b],
                                            eg[b][3], eg[b + 1][3]))
        enc_out_shapes = tuple(
            jax.ShapeDtypeStruct((enc_cp[b + 1], eg[b + 1][3]), jnp.float32)
            for b in range(n_enc))
        enc_outs = _call(
            functools.partial(_conv_encoder_kernel,
                              grids=tuple((g[1], g[3]) for g in eg)),
            enc_args, enc_out_shapes)

        feats_enc = []
        for b in range(n_enc):
            c = enc_sizes[b]
            hh, ww, m, _mp = eg[b + 1]
            feats_enc.append(enc_outs[b][:c, :m]
                             .reshape(c, n, hh, ww).transpose(1, 0, 2, 3))

        # --------- fc encoder + fc decoder: one fused kernel ---------
        flat = feats_enc[-1].reshape(n, first_fc)   # 'b c w h -> b (c w h)'
        fc_layers = []
        for i, lyr in enumerate(params["fc_enc"]):
            last = i == n_fc_enc - 1
            fc_layers.append((lyr["lin"], None if last else lyr["bn"],
                              not last))
        for lyr in params["fc_dec"]:
            fc_layers.append((lyr["lin"], lyr["bn"], True))
        fc_args, plan = [flat], []
        for lin, bn, act in fc_layers:
            fout = lin["w"].shape[0]
            fc_args.append(lin["w"].T.astype(_MM_DTYPE))
            fc_args.append(jnp.stack([
                lin["b"],
                bn["g"] if bn is not None else jnp.ones((fout,), jnp.float32),
                bn["b"] if bn is not None else jnp.zeros((fout,), jnp.float32),
            ]))
            plan.append((bn is not None, act))
        flat = _call(functools.partial(_fc_stack_kernel, plan=tuple(plan)),
                     fc_args,
                     (jax.ShapeDtypeStruct((n, first_fc), jnp.float32),))[0]

        # ---------------- conv decoder: one fused kernel ----------------
        z = flat.reshape(n, *intermediate)          # 'b (c w h) -> b c w h'
        z = jnp.transpose(z, (1, 0, 2, 3)).reshape(intermediate[0], dg[0][2])
        z = jnp.pad(z, ((0, dec_cp[0] - intermediate[0]),
                        (0, dg[0][3] - dg[0][2])))
        dec_args = [z] + [masks(g) for g in dg[1:]]
        for b, blk in enumerate(params["dec_blocks"]):
            dec_args += _pack_dec_block(blk, dec_cp[b], dec_cp[b + 1])
            dec_args.append(_upsample_mat(n, dg[b][0], dg[b][1],
                                          dec_strides[b],
                                          dg[b][3], dg[b + 1][3]))
        dec_out_shapes = tuple(
            jax.ShapeDtypeStruct((dec_cp[b + 1], dg[b + 1][3]), jnp.float32)
            for b in range(n_dec))
        dec_out_shapes += (jax.ShapeDtypeStruct((dec_cp[-1], dg[-1][3]),
                                                jnp.float32),)
        dec_outs = _call(
            functools.partial(_conv_decoder_kernel,
                              grids=tuple((g[1], g[3]) for g in dg),
                              valid=tuple(g[2] for g in dg),
                              sigmoid_last=True),
            dec_args, dec_out_shapes)

        feats_dec = []
        for b in range(n_dec):
            c = dec_out_chans[b]
            hh, ww, m, _mp = dg[b + 1]
            feats_dec.append(dec_outs[b][:c, :m]
                             .reshape(c, n, hh, ww).transpose(1, 0, 2, 3))
        hh, ww, m, _mp = dg[-1]
        out = dec_outs[-1][:color, :m].reshape(color, n, hh, ww) \
                                      .transpose(1, 0, 2, 3)
        feats_dec.append(out)                       # final nn.Sigmoid output
        return out, feats_enc, feats_dec

    return params, forward


# ------------------------------------ main ------------------------------------

if __name__ == "__main__":
    key = jax.random.PRNGKey(0)
    pkey, xkey = jax.random.split(key)
    cfg = {"input_shape": (16, 16),
           "encoder_sizes": [8, 16],
           "fc_sizes": [32, 16],
           "temporal_strides": (2, 2),
           "color_channels": 4}
    params, forward = make_model(cfg, pkey)
    x = jax.random.normal(xkey, (2, 4, 16, 16), jnp.float32)

    fwd = jax.jit(forward)
    out, feats_enc, feats_dec = fwd(params, x)
    jax.block_until_ready(out)

    assert out.shape == (2, 4, 16, 16), out.shape
    assert feats_enc[0].shape == (2, 8, 8, 8), feats_enc[0].shape
    assert feats_enc[1].shape == (2, 16, 4, 4), feats_enc[1].shape
    assert feats_dec[0].shape == (2, 8, 8, 8), feats_dec[0].shape
    assert feats_dec[1].shape == (2, 4, 16, 16), feats_dec[1].shape
    assert feats_dec[2].shape == (2, 4, 16, 16), feats_dec[2].shape
    assert bool(jnp.all(jnp.isfinite(out)))
    assert bool(jnp.all((out >= 0.0) & (out <= 1.0)))
    print("KERNEL_OK")
</pallas_src>

<mosaic_0001>
module attributes {stable_mosaic.version = 11 : i64} {
  func.func @probe(%arg0: memref<8x128xf32, #tpu.memory_space<vmem>>, %arg1: memref<8x128xf32, #tpu.memory_space<vmem>>) attributes {dimension_semantics = [], scalar_prefetch = 0 : i64, scratch_operands = 0 : i64, tpu.core_type = #tpu.core_type<tc>} {
    %c0 = arith.constant 0 : index
    %c0_0 = arith.constant 0 : index
    %0 = vector.load %arg0[%c0, %c0_0] : memref<8x128xf32, #tpu.memory_space<vmem>>, vector<8x128xf32>
    %c1_i32 = arith.constant 1 : i32
    %1 = tpu.dynamic_rotate %0 by %c1_i32 dim 1 : vector<8x128xf32>, i32 -> vector<8x128xf32>
    %c0_1 = arith.constant 0 : index
    %c0_2 = arith.constant 0 : index
    %2 = vector.load %arg1[%c0_1, %c0_2] : memref<8x128xf32, #tpu.memory_space<vmem>>, vector<8x128xf32>
    tpu.vector_store %arg1[%c0_1, %c0_2], %1 {strides = array<i32>} : memref<8x128xf32, #tpu.memory_space<vmem>>, vector<8x128xf32>,
    return
  }
}

</mosaic_0001>

<bundles_post_ra>
// kernel: tpu_custom_call.1
= control target key start
LH: loop header
LB: loop body
LE: loop exit
PB: predicated region body
PF: predicated region fallthrough
CT: control target
= control target key end

     0   :  { %6 = vsyncpa [#allocation3], 0  ;;  %s118_s0 = inlined_call_operand.hbm [shape: f32[8,128], index: 0, kind: input, shape index: {}]   ;;  %s119_s1 = inlined_call_operand.hbm [shape: f32[8,128], index: 1, kind: output, shape index: {}]  }
   0x1   :  { %7 = vsyncpa [#allocation4], 0  ;;  %s13_s8 = sshll.u32 %s118_s0, 4  ;;  %s99_s9 = smov [#allocation2]   ;;  %s14_s8 = int_to_ptr.hbm [resolvable:$true] %s13_s8 }
   0x2   :  { %s15_s10 = sshll.u32 %s99_s9, 4  ;;  %s16_s10 = int_to_ptr.vmem [resolvable:$true] %s15_s10 }
   0x3   :  { %18 = dma.hbm_to_vmem [thread:$0]  %s14_s8, 128, %s16_s10, [#allocation3]  }
   0x4   :  { %95 = dma.done.wait [#allocation3], 128  }
   0x5   :  { %96 = vsyncadd [#allocation3], 4294967168  ;;  %v23_v0 = vld [vmem:[#allocation2] sm:$0xff]  ;;  %s100_s11 = smov 1   ;;  %s101_s12 = smov [#allocation5]  }
   0x6   :  { %24 = vrot.lane.b32.xlu0 %v23_v0, %s100_s11  ;;  %s32_s13 = sshll.u32 %s101_s12, 4  ;;  %s34_s16 = sshll.u32 %s119_s1, 4  ;;  %s33_s13 = int_to_ptr.vmem [resolvable:$true] %s32_s13  ;;  %s35_s16 = int_to_ptr.hbm [resolvable:$true] %s34_s16 }
  0x78   :  { %v25_v1 = vpop.permute.xlu0 %24 }
  0x79   :  { %26 = vst [vmem:[#allocation5] sm:$0xff] %v25_v1 }
  0x7a   :  { %37 = dma.vmem_to_hbm [thread:$0]  %s33_s13, 128, %s35_s16, [#allocation4]  }
  0x7b   :  { %97 = dma.done.wait [#allocation4], 128  }
  0x7c   :  { %98 = vsyncadd [#allocation4], 4294967168 }
  0x7d   :  { %42 = vsyncpa [#allocation3], 1 }
  0x7e   :  { %43 = vsyncpa [#allocation4], 1 }

</bundles_post_ra>
